<compile_context>
chip_gen: v7x
topology: tpu7x:2x2x1
jax: 0.10.0
libtpu: 0.0.40
codegen_flags: <defaults>
</compile_context>

<pallas_src>
import functools
import math
from typing import Dict, List, NamedTuple, Tuple, Union

import jax
import jax.numpy as jnp
from jax.experimental import pallas as pl
from jax.experimental.pallas import tpu as pltpu

_LANE = 128


def _round_up(x: int, m: int) -> int:
    return ((x + m - 1) // m) * m


def _sublane(dtype) -> int:
    # bf16 packs 2 rows per sublane -> use 16-row granularity; f32 -> 8.
    return 16 if dtype == jnp.bfloat16 else 8


# ----------------------------------------------------------------------------
# Pallas kernel: all layers of all stacked nets fused in one body.
#   refs = (x_ref, w_0, ..., w_{L-1}, b_ref, o_ref)
#     x_ref : [N, TB, D0]        (compute dtype)   batch tile selected by grid
#     w_i   : [N, D_i, D_{i+1}]  (compute dtype)   full block, constant index
#     b_ref : [N, L, Dmax]       (f32)             all biases packed
#     o_ref : [N, TB, D_L]       (f32)
#   D_i (i>=1) are multiples of 128; TB is a multiple of the sublane pack.
# ----------------------------------------------------------------------------
def _fused_mlp_kernel(*refs, num_nets: int, num_layers: int,
                      dims: Tuple[int, ...], activation: str, compute_dtype):
    x_ref = refs[0]
    w_refs = refs[1:1 + num_layers]
    b_ref = refs[1 + num_layers]
    o_ref = refs[2 + num_layers]

    for n in range(num_nets):                      # nets folded into the body
        h = x_ref[n]                               # [TB, D0]   compute dtype
        b_all = b_ref[n]                           # [L, Dmax]  f32
        for i in range(num_layers):
            dout = dims[i + 1]
            w = w_refs[i][n]                       # [D_i, D_{i+1}]
            acc = jnp.dot(h, w, preferred_element_type=jnp.float32)
            acc = acc + b_all[i:i + 1, 0:dout]     # [1, dout] broadcast
            if activation == "tanh":
                acc = jnp.tanh(acc)                # EUP slot, effectively free
            elif activation == "relu":
                acc = jnp.maximum(acc, 0.0)
            # "identity": nothing
            h = acc if i == num_layers - 1 else acc.astype(compute_dtype)
        o_ref[n] = h.astype(o_ref.dtype)


def _fused_mlp_stack(x, ws, b_packed, *, dims, activation, compute_dtype,
                     out_dtype, tb):
    """x: [N, Bp, D0]; ws[i]: [N, D_i, D_{i+1}]; b_packed: [N, L, Dmax]."""
    N, Bp, D0 = x.shape
    L = len(ws)
    dmax = b_packed.shape[-1]
    grid = (Bp // tb,)

    in_specs = [pl.BlockSpec((N, tb, D0), lambda t: (0, t, 0))]
    for i in range(L):
        din, dout = dims[i], dims[i + 1]
        # Full block, constant index -> Pallas skips re-DMA across batch tiles.
        in_specs.append(pl.BlockSpec((N, din, dout), lambda t: (0, 0, 0)))
    in_specs.append(pl.BlockSpec((N, L, dmax), lambda t: (0, 0, 0)))
    out_specs = pl.BlockSpec((N, tb, dims[-1]), lambda t: (0, t, 0))

    kernel = functools.partial(_fused_mlp_kernel, num_nets=N, num_layers=L,
                               dims=tuple(dims), activation=activation,
                               compute_dtype=compute_dtype)

    # Explicit VMEM budget (portable to v7x's 64 MiB part): double-buffered
    # inputs/outputs + weights + f32 accumulator, x2 headroom, capped at 48 MiB.
    cbytes = jnp.dtype(compute_dtype).itemsize
    obytes = jnp.dtype(out_dtype).itemsize
    w_bytes = sum(N * dims[i] * dims[i + 1] for i in range(L)) * cbytes
    b_bytes = N * L * dmax * 4
    io_bytes = N * tb * (D0 * cbytes + dims[-1] * obytes)
    need = 2 * (w_bytes + b_bytes + io_bytes) + N * tb * max(dims) * 4
    vmem_limit = int(min(max(2 * need, 16 * 2**20), 48 * 2**20))

    return pl.pallas_call(
        kernel,
        out_shape=jax.ShapeDtypeStruct((N, Bp, dims[-1]), out_dtype),
        grid=grid,
        in_specs=in_specs,
        out_specs=out_specs,
        compiler_params=pltpu.CompilerParams(
            dimension_semantics=("parallel",),   # batch tiles -> megacore on v7x
            vmem_limit_bytes=vmem_limit,
        ),
    )(x, *ws, b_packed)


# ----------------------------------------------------------------------------
# Jitted host-side forward: pad -> fused kernel -> slice, all in one dispatch.
# ----------------------------------------------------------------------------
class _StackCfg(NamedTuple):
    dims: Tuple[int, ...]       # padded layer dims (D0 ... D_L)
    out_dims: Tuple[int, ...]   # true latent dim per net
    activation: str
    compute_dtype: type
    out_dtype: type
    tb_max: int


@functools.partial(jax.jit, static_argnums=(0,))
def _forward_stack(cfg: _StackCfg, feats, ws, b_packed):
    B = feats[0].shape[0]
    sub = _sublane(cfg.compute_dtype)
    tb = max(_round_up(B, sub), sub) if B <= cfg.tb_max else cfg.tb_max
    Bp = _round_up(B, tb)
    D0 = cfg.dims[0]

    x_parts = []
    for f in feats:
        fp = jnp.pad(f.astype(cfg.compute_dtype),
                     ((0, Bp - B), (0, D0 - f.shape[1])))
        x_parts.append(fp)
    x = jnp.stack(x_parts, axis=0)                       # [N, Bp, D0]

    out = _fused_mlp_stack(x, list(ws), b_packed,
                           dims=cfg.dims, activation=cfg.activation,
                           compute_dtype=cfg.compute_dtype,
                           out_dtype=cfg.out_dtype, tb=tb)
    return tuple(out[n, :B, :d] for n, d in enumerate(cfg.out_dims))


# ----------------------------------------------------------------------------
# MlpBuild in JAX (deterministic init, forward runs a single fused kernel)
# ----------------------------------------------------------------------------
class MlpBuildPallas:
    def __init__(
        self,
        feature_actor_dim: int,
        feature_critic_dim: int,
        net_arch: Union[List[int], Dict[str, List[int]]],
        activation: str = "tanh",
        compute_dtype=jnp.bfloat16,
        seed: int = 0,
    ):
        if activation not in ("tanh", "relu", "identity"):
            raise ValueError(f"unsupported activation: {activation}")
        if isinstance(net_arch, dict):
            pi_dims = list(net_arch.get("pi", []))
            vf_dims = list(net_arch.get("vf", []))
        else:
            pi_dims = vf_dims = list(net_arch)

        self.activation = activation
        self.compute_dtype = compute_dtype
        self.out_dtype = jnp.float32
        self.tb_max = 4096 if compute_dtype == jnp.bfloat16 else 2048

        key = jax.random.PRNGKey(seed)

        def build_net(in_dim, layer_dims, key):
            params = []
            last = in_dim
            for out_dim in layer_dims:
                key, kw, kb = jax.random.split(key, 3)
                # Mimic nn.Linear uniform(-1/sqrt(in), 1/sqrt(in)) init.
                bound = 1.0 / math.sqrt(last)
                w = jax.random.uniform(kw, (last, out_dim), jnp.float32, -bound, bound)
                b = jax.random.uniform(kb, (out_dim,), jnp.float32, -bound, bound)
                params.append((w, b))
                last = out_dim
            return params, last, key

        self.policy_params, self.latent_dim_pi, key = build_net(
            feature_actor_dim, pi_dims, key)
        self.value_params, self.latent_dim_vf, key = build_net(
            feature_critic_dim, vf_dims, key)
        self.feature_actor_dim = feature_actor_dim
        self.feature_critic_dim = feature_critic_dim

        # Per-net packs (standalone forward_actor / forward_critic).
        self._pi_pack = self._pack([self.policy_params], [feature_actor_dim],
                                   [self.latent_dim_pi])
        self._vf_pack = self._pack([self.value_params], [feature_critic_dim],
                                   [self.latent_dim_vf])
        # Stacked (pi, vf) pack: one kernel launch for the whole forward().
        if len(pi_dims) == len(vf_dims) and len(pi_dims) > 0:
            self._both_pack = self._pack(
                [self.policy_params, self.value_params],
                [feature_actor_dim, feature_critic_dim],
                [self.latent_dim_pi, self.latent_dim_vf])
        else:
            self._both_pack = None

    # ------------------------------------------------------------------ utils
    def _pack(self, nets, in_dims, out_dims):
        """Pack N nets (same layer count L>0) into stacked padded params."""
        L = len(nets[0])
        if L == 0:
            return None
        N = len(nets)
        sub = _sublane(self.compute_dtype)
        dims_true = [max(in_dims)]
        for i in range(L):
            dims_true.append(max(net[i][0].shape[1] for net in nets))
        # D0 only rounded to the sublane pack; layer OUTPUT dims lane-padded.
        dims_p = [_round_up(dims_true[0], sub)] + \
                 [_round_up(d, _LANE) for d in dims_true[1:]]
        dmax = max(dims_p[1:])

        ws = []
        b_packed = jnp.zeros((N, L, dmax), jnp.float32)
        for i in range(L):
            w = jnp.zeros((N, dims_p[i], dims_p[i + 1]), self.compute_dtype)
            for n, net in enumerate(nets):
                wi, bi = net[i]
                w = w.at[n, :wi.shape[0], :wi.shape[1]].set(
                    wi.astype(self.compute_dtype))
                b_packed = b_packed.at[n, i, :bi.shape[0]].set(bi)
            ws.append(w)

        cfg = _StackCfg(dims=tuple(dims_p), out_dims=tuple(out_dims),
                        activation=self.activation,
                        compute_dtype=self.compute_dtype,
                        out_dtype=self.out_dtype, tb_max=self.tb_max)
        return cfg, tuple(ws), b_packed

    # --------------------------------------------------------------- forward
    def forward_actor(self, features: jax.Array) -> jax.Array:
        if self._pi_pack is None:            # empty net_arch -> identity
            return features
        cfg, ws, b = self._pi_pack
        return _forward_stack(cfg, (features,), ws, b)[0]

    def forward_critic(self, features: jax.Array) -> jax.Array:
        if self._vf_pack is None:
            return features
        cfg, ws, b = self._vf_pack
        return _forward_stack(cfg, (features,), ws, b)[0]

    def forward(self, features):
        xa, xv = features[0], features[1]
        if self._both_pack is not None and xa.shape[0] == xv.shape[0]:
            cfg, ws, b = self._both_pack
            out = _forward_stack(cfg, (xa, xv), ws, b)   # one dispatch total
            return out[0], out[1]
        # Fallback (different layer counts or an empty net): one call per net.
        return self.forward_actor(xa), self.forward_critic(xv)


# ----------------------------------------------------------------------------
# Reference (pure JAX) for a sanity check
# ----------------------------------------------------------------------------
def _ref_apply(params, x, activation):
    for (w, b) in params:
        x = x @ w + b
        if activation == "tanh":
            x = jnp.tanh(x)
        elif activation == "relu":
            x = jnp.maximum(x, 0.0)
    return x


if __name__ == "__main__":
    batch = 2
    feature_actor_dim = 32
    feature_critic_dim = 32
    net_arch = {"pi": [64, 64], "vf": [64, 64]}    # SB3 default style

    key = jax.random.PRNGKey(0)
    k_a, k_c = jax.random.split(key)
    feats_actor = jax.random.normal(k_a, (batch, feature_actor_dim), jnp.float32)
    feats_critic = jax.random.normal(k_c, (batch, feature_critic_dim), jnp.float32)

    # Default bf16 compute (f32 MXU accumulation) -> relaxed tolerance.
    model = MlpBuildPallas(feature_actor_dim, feature_critic_dim, net_arch,
                           activation="tanh", compute_dtype=jnp.bfloat16, seed=0)
    latent_pi, latent_vf = model.forward((feats_actor, feats_critic))
    latent_pi = jax.block_until_ready(latent_pi)
    latent_vf = jax.block_until_ready(latent_vf)
    ref_pi = _ref_apply(model.policy_params, feats_actor, "tanh")
    ref_vf = _ref_apply(model.value_params, feats_critic, "tanh")
    assert latent_pi.shape == (batch, model.latent_dim_pi)
    assert latent_vf.shape == (batch, model.latent_dim_vf)
    assert jnp.allclose(latent_pi, ref_pi, atol=2e-2, rtol=2e-2)
    assert jnp.allclose(latent_vf, ref_vf, atol=2e-2, rtol=2e-2)

    # f32 compute path: tight numerical check of the same kernel.
    model32 = MlpBuildPallas(feature_actor_dim, feature_critic_dim, net_arch,
                             activation="tanh", compute_dtype=jnp.float32, seed=0)
    lp32, lv32 = model32.forward((feats_actor, feats_critic))
    lp32 = jax.block_until_ready(lp32)
    lv32 = jax.block_until_ready(lv32)
    assert jnp.allclose(lp32, ref_pi, atol=1e-5, rtol=1e-5)
    assert jnp.allclose(lv32, ref_vf, atol=1e-5, rtol=1e-5)

    # Standalone per-net path (used when pi/vf structures differ).
    pi_only = jax.block_until_ready(model32.forward_actor(feats_actor))
    assert jnp.allclose(pi_only, ref_pi, atol=1e-5, rtol=1e-5)

    print("KERNEL_OK")
</pallas_src>

<mosaic_0001>
module attributes {stable_mosaic.version = 11 : i64} {
  func.func @_fused_mlp_kernel(%arg0: i32, %arg1: memref<2x16x32xbf16, #tpu.memory_space<vmem>>, %arg2: memref<2x32x128xbf16, #tpu.memory_space<vmem>>, %arg3: memref<2x128x128xbf16, #tpu.memory_space<vmem>>, %arg4: memref<2x2x128xf32, #tpu.memory_space<vmem>>, %arg5: memref<2x16x128xf32, #tpu.memory_space<vmem>>) attributes {dimension_semantics = [#tpu.dimension_semantics<parallel>], iteration_bounds = array<i64: 1>, scalar_prefetch = 0 : i64, scratch_operands = 0 : i64, tpu.core_type = #tpu.core_type<tc>, window_params = [{transform_indices = @transform_0, window_bounds = array<i64: 2, 16, 32>}, {pipeline_mode = #tpu.pipeline_mode<synchronous>, transform_indices = @transform_1, window_bounds = array<i64: 2, 32, 128>}, {pipeline_mode = #tpu.pipeline_mode<synchronous>, transform_indices = @transform_2, window_bounds = array<i64: 2, 128, 128>}, {pipeline_mode = #tpu.pipeline_mode<synchronous>, transform_indices = @transform_3, window_bounds = array<i64: 2, 2, 128>}, {transform_indices = @transform_4, window_bounds = array<i64: 2, 16, 128>}]} {
    %c0 = arith.constant 0 : index
    %c0_0 = arith.constant 0 : index
    %c0_1 = arith.constant 0 : index
    %0 = vector.load %arg1[%c0, %c0_0, %c0_1] : memref<2x16x32xbf16, #tpu.memory_space<vmem>>, vector<1x16x32xbf16>
    %1 = vector.shape_cast %0 : vector<1x16x32xbf16> to vector<16x32xbf16>
    %c0_2 = arith.constant 0 : index
    %c0_3 = arith.constant 0 : index
    %c0_4 = arith.constant 0 : index
    %2 = vector.load %arg4[%c0_2, %c0_3, %c0_4] : memref<2x2x128xf32, #tpu.memory_space<vmem>>, vector<1x2x128xf32>
    %3 = vector.shape_cast %2 : vector<1x2x128xf32> to vector<2x128xf32>
    %c0_5 = arith.constant 0 : index
    %c0_6 = arith.constant 0 : index
    %c0_7 = arith.constant 0 : index
    %4 = vector.load %arg2[%c0_5, %c0_6, %c0_7] : memref<2x32x128xbf16, #tpu.memory_space<vmem>>, vector<1x32x128xbf16>
    %5 = vector.shape_cast %4 : vector<1x32x128xbf16> to vector<32x128xbf16>
    %cst = arith.constant dense<0.000000e+00> : vector<16x128xf32>
    %6 = tpu.matmul %1, %5, %cst {dimension_numbers = #tpu.dot_dimension_numbers<[1], [0], [0], [1], [0, 0, 1, 1], [], []>} : vector<16x32xbf16>, vector<32x128xbf16>, vector<16x128xf32> -> vector<16x128xf32>
    %7 = vector.extract_strided_slice %3 {offsets = [0, 0], sizes = [1, 128], strides = [1, 1]} : vector<2x128xf32> to vector<1x128xf32>
    %8 = vector.broadcast %7 : vector<1x128xf32> to vector<16x128xf32>
    %9 = arith.addf %6, %8 : vector<16x128xf32>
    %10 = math.tanh %9 : vector<16x128xf32>
    %11 = arith.truncf %10 : vector<16x128xf32> to vector<16x128xbf16>
    %c0_8 = arith.constant 0 : index
    %c0_9 = arith.constant 0 : index
    %c0_10 = arith.constant 0 : index
    %12 = vector.load %arg3[%c0_8, %c0_9, %c0_10] : memref<2x128x128xbf16, #tpu.memory_space<vmem>>, vector<1x128x128xbf16>
    %13 = vector.shape_cast %12 : vector<1x128x128xbf16> to vector<128x128xbf16>
    %cst_11 = arith.constant dense<0.000000e+00> : vector<16x128xf32>
    %14 = tpu.matmul %11, %13, %cst_11 {dimension_numbers = #tpu.dot_dimension_numbers<[1], [0], [0], [1], [0, 0, 1, 1], [], []>} : vector<16x128xbf16>, vector<128x128xbf16>, vector<16x128xf32> -> vector<16x128xf32>
    %15 = vector.extract_strided_slice %3 {offsets = [1, 0], sizes = [1, 128], strides = [1, 1]} : vector<2x128xf32> to vector<1x128xf32>
    %16 = vector.broadcast %15 : vector<1x128xf32> to vector<16x128xf32>
    %17 = arith.addf %14, %16 : vector<16x128xf32>
    %18 = math.tanh %17 : vector<16x128xf32>
    %c0_12 = arith.constant 0 : index
    %c0_13 = arith.constant 0 : index
    %c0_14 = arith.constant 0 : index
    %19 = vector.load %arg5[%c0_12, %c0_13, %c0_14] : memref<2x16x128xf32, #tpu.memory_space<vmem>>, vector<1x16x128xf32>
    %20 = vector.shape_cast %19 : vector<1x16x128xf32> to vector<16x128xf32>
    %21 = vector.shape_cast %18 : vector<16x128xf32> to vector<1x16x128xf32>
    tpu.vector_store %arg5[%c0_12, %c0_13, %c0_14], %21 {strides = array<i32>} : memref<2x16x128xf32, #tpu.memory_space<vmem>>, vector<1x16x128xf32>,
    %c1 = arith.constant 1 : index
    %c0_15 = arith.constant 0 : index
    %c0_16 = arith.constant 0 : index
    %22 = vector.load %arg1[%c1, %c0_15, %c0_16] : memref<2x16x32xbf16, #tpu.memory_space<vmem>>, vector<1x16x32xbf16>
    %23 = vector.shape_cast %22 : vector<1x16x32xbf16> to vector<16x32xbf16>
    %c1_17 = arith.constant 1 : index
    %c0_18 = arith.constant 0 : index
    %c0_19 = arith.constant 0 : index
    %24 = vector.load %arg4[%c1_17, %c0_18, %c0_19] : memref<2x2x128xf32, #tpu.memory_space<vmem>>, vector<1x2x128xf32>
    %25 = vector.shape_cast %24 : vector<1x2x128xf32> to vector<2x128xf32>
    %c1_20 = arith.constant 1 : index
    %c0_21 = arith.constant 0 : index
    %c0_22 = arith.constant 0 : index
    %26 = vector.load %arg2[%c1_20, %c0_21, %c0_22] : memref<2x32x128xbf16, #tpu.memory_space<vmem>>, vector<1x32x128xbf16>
    %27 = vector.shape_cast %26 : vector<1x32x128xbf16> to vector<32x128xbf16>
    %cst_23 = arith.constant dense<0.000000e+00> : vector<16x128xf32>
    %28 = tpu.matmul %23, %27, %cst_23 {dimension_numbers = #tpu.dot_dimension_numbers<[1], [0], [0], [1], [0, 0, 1, 1], [], []>} : vector<16x32xbf16>, vector<32x128xbf16>, vector<16x128xf32> -> vector<16x128xf32>
    %29 = vector.extract_strided_slice %25 {offsets = [0, 0], sizes = [1, 128], strides = [1, 1]} : vector<2x128xf32> to vector<1x128xf32>
    %30 = vector.broadcast %29 : vector<1x128xf32> to vector<16x128xf32>
    %31 = arith.addf %28, %30 : vector<16x128xf32>
    %32 = math.tanh %31 : vector<16x128xf32>
    %33 = arith.truncf %32 : vector<16x128xf32> to vector<16x128xbf16>
    %c1_24 = arith.constant 1 : index
    %c0_25 = arith.constant 0 : index
    %c0_26 = arith.constant 0 : index
    %34 = vector.load %arg3[%c1_24, %c0_25, %c0_26] : memref<2x128x128xbf16, #tpu.memory_space<vmem>>, vector<1x128x128xbf16>
    %35 = vector.shape_cast %34 : vector<1x128x128xbf16> to vector<128x128xbf16>
    %cst_27 = arith.constant dense<0.000000e+00> : vector<16x128xf32>
    %36 = tpu.matmul %33, %35, %cst_27 {dimension_numbers = #tpu.dot_dimension_numbers<[1], [0], [0], [1], [0, 0, 1, 1], [], []>} : vector<16x128xbf16>, vector<128x128xbf16>, vector<16x128xf32> -> vector<16x128xf32>
    %37 = vector.extract_strided_slice %25 {offsets = [1, 0], sizes = [1, 128], strides = [1, 1]} : vector<2x128xf32> to vector<1x128xf32>
    %38 = vector.broadcast %37 : vector<1x128xf32> to vector<16x128xf32>
    %39 = arith.addf %36, %38 : vector<16x128xf32>
    %40 = math.tanh %39 : vector<16x128xf32>
    %c1_28 = arith.constant 1 : index
    %c0_29 = arith.constant 0 : index
    %c0_30 = arith.constant 0 : index
    %41 = vector.load %arg5[%c1_28, %c0_29, %c0_30] : memref<2x16x128xf32, #tpu.memory_space<vmem>>, vector<1x16x128xf32>
    %42 = vector.shape_cast %41 : vector<1x16x128xf32> to vector<16x128xf32>
    %43 = vector.shape_cast %40 : vector<16x128xf32> to vector<1x16x128xf32>
    tpu.vector_store %arg5[%c1_28, %c0_29, %c0_30], %43 {strides = array<i32>} : memref<2x16x128xf32, #tpu.memory_space<vmem>>, vector<1x16x128xf32>,
    return
  }
  func.func @transform_0(%arg0: i32) -> (i32, i32, i32) {
    %c0_i32 = arith.constant 0 : i32
    %c0_i32_0 = arith.constant 0 : i32
    %c0_i32_1 = arith.constant 0 : i32
    return %c0_i32, %arg0, %c0_i32_0 : i32, i32, i32
  }
  func.func @transform_1(%arg0: i32) -> (i32, i32, i32) {
    %c0_i32 = arith.constant 0 : i32
    %c0_i32_0 = arith.constant 0 : i32
    %c0_i32_1 = arith.constant 0 : i32
    %c0_i32_2 = arith.constant 0 : i32
    return %c0_i32, %c0_i32_0, %c0_i32_1 : i32, i32, i32
  }
  func.func @transform_2(%arg0: i32) -> (i32, i32, i32) {
    %c0_i32 = arith.constant 0 : i32
    %c0_i32_0 = arith.constant 0 : i32
    %c0_i32_1 = arith.constant 0 : i32
    %c0_i32_2 = arith.constant 0 : i32
    return %c0_i32, %c0_i32_0, %c0_i32_1 : i32, i32, i32
  }
  func.func @transform_3(%arg0: i32) -> (i32, i32, i32) {
    %c0_i32 = arith.constant 0 : i32
    %c0_i32_0 = arith.constant 0 : i32
    %c0_i32_1 = arith.constant 0 : i32
    %c0_i32_2 = arith.constant 0 : i32
    return %c0_i32, %c0_i32_0, %c0_i32_1 : i32, i32, i32
  }
  func.func @transform_4(%arg0: i32) -> (i32, i32, i32) {
    %c0_i32 = arith.constant 0 : i32
    %c0_i32_0 = arith.constant 0 : i32
    %c0_i32_1 = arith.constant 0 : i32
    return %c0_i32, %arg0, %c0_i32_0 : i32, i32, i32
  }
}

</mosaic_0001>

<bundles_post_ra>
// kernel: _forward_stack.1
= control target key start
LH: loop header
LB: loop body
LE: loop exit
PB: predicated region body
PF: predicated region fallthrough
CT: control target
= control target key end

     0   :  { %9 = vsyncpa [#allocation3], 0  ;;  %s599_s15 = smov [#allocation2]   ;;  %s705_s0 = inlined_call_operand.vmem [shape: bf16[2,16,32], index: 0, kind: input, shape index: {}]   ;;  %s706_s1 = inlined_call_operand.vmem [shape: bf16[2,32,128], index: 1, kind: input, shape index: {}]   ;;  %s707_s2 = inlined_call_operand.hbm [shape: bf16[2,128,128], index: 2, kind: input, shape index: {}]   ;;  %s708_s3 = inlined_call_operand.vmem [shape: f32[2,2,128], index: 3, kind: input, shape index: {}]   ;;  %s709_s4 = inlined_call_operand.vmem [shape: f32[2,16,128], index: 4, kind: output, shape index: {}]  }
   0x1   :  { %s19_s16 = sshll.u32 %s599_s15, 4  ;;  %s575_s19 = scalar_lea.hbm %s707_s2, 2048  ;;  %s20_s16 = int_to_ptr.vmem [resolvable:$true] %s19_s16 }
   0x2   :  { %p576_p0 = scmp.ne.s32.totalorder %s707_s2, %s575_s19  ;;  %p579_p1 = scmp.lt.u32.totalorder %s575_s19, %s707_s2 }
   0x4   :  { %p581_p2 = pnand %p579_p1, %p576_p0 }
   0x6   :  { %584 = shalt.err (!%p581_p2)
}
   0x7   :  { %s585_s24 = scalar_lea.vmem %s20_s16, 2048  ;;  %p590_p4 = scmp.lt.s32.totalorder %s20_s16, %s20_s16 }
   0x8   :  { %p586_p3 = scmp.ne.s32.totalorder %s20_s16, %s585_s24  ;;  %p591_p5 = scmp.lt.s32.totalorder %s585_s24, %s585_s24 }
   0xa   :  { %p592_p6 = por %p591_p5, %p590_p4 }
   0xc   :  { %p593_p7 = pnand %p592_p6, %p586_p3 }
   0xe   :  { %596 = shalt.err (!%p593_p7)
}
   0xf   :  { %s600_s25 = smov 64   ;;  %s601_s26 = smov 4  }
  0x10   :  { %25 = dma.hbm_to_vmem [thread:$0]  %s707_s2, 2048, %s20_s16, [#allocation3], %s600_s25, %s600_s25, %s601_s26  }
  0x11   :  { %597 = dma.done.wait [#allocation3], 2048  }
  0x12   :  { %598 = vsyncadd [#allocation3], 4294965248  ;;  %v602_v0 = vmov 0.0   ;;  %vm603_vm0 = vmmov 0   ;;  %v537_v1 = vld [vmem:[%s706_s1] sm:$0xff]   ;;  %v538_v2 = vld [vmem:[%s706_s1 + $0x10] sm:$0xff]   ;;  %v39_v23 = vlaneseq }
  0x13   :  { %476 = vmatprep.subr.bf16.mxu1 %v602_v0  ;;  %504 = vmatprep.subr.bf16.mxu0 %v602_v0  ;;  %v539_v3 = vld [vmem:[%s706_s1 + $0x8] sm:$0xff]   ;;  %v540_v4 = vld [vmem:[%s706_s1 + $0x18] sm:$0xff]   ;;  %v541_v5 = vld [vmem:[%s705_s0] sm:$0xff]   ;;  %vm60_vm1 = vcmask 261120  }
  0x14   :  { %480 = vmatprep.mubr.msk.bf16.mxu1 %vm603_vm0, %v602_v0  ;;  %508 = vmatprep.mubr.msk.bf16.mxu0 %vm603_vm0, %v602_v0  ;;  %v542_v6 = vld [vmem:[%s705_s0 + $0x8] sm:$0xff]   ;;  %v543_v7 = vld [vmem:[#allocation2] sm:$0xff]   ;;  %v545_v9 = vld [vmem:[#allocation2 + $0x8] sm:$0xff]   ;;  %v40_v24 = vshrl.u32 %v39_v23, 7 }
  0x15   :  { %477 = vmatpush3.bf16.msra.mxu1 %v537_v1  ;;  %505 = vmatpush3.bf16.msra.mxu0 %v538_v2  ;;  %v544_v8 = vld [vmem:[#allocation2 + $0x40] sm:$0xff]   ;;  %v546_v10 = vld [vmem:[#allocation2 + $0x48] sm:$0xff]   ;;  %v547_v11 = vld [vmem:[#allocation2 + $0x10] sm:$0xff]  }
  0x16   :  { %478 = vmatprep.subr.bf16.mxu1 %v602_v0  ;;  %506 = vmatprep.subr.bf16.mxu0 %v602_v0  ;;  %v548_v12 = vld [vmem:[#allocation2 + $0x50] sm:$0xff]   ;;  %v549_v13 = vld [vmem:[#allocation2 + $0x18] sm:$0xff]   ;;  %v551_v15 = vld [vmem:[#allocation2 + $0x20] sm:$0xff]   ;;  %v41_v25 = vsub.s32 0, %v40_v24  ;;  %v126_v48 = vsub.s32 1, %v40_v24 }
  0x17   :  { %v550_v14 = vld [vmem:[#allocation2 + $0x58] sm:$0xff]   ;;  %v552_v16 = vld [vmem:[#allocation2 + $0x60] sm:$0xff]   ;;  %v553_v17 = vld [vmem:[#allocation2 + $0x28] sm:$0xff]  }
  0x18   :  { %v554_v18 = vld [vmem:[#allocation2 + $0x68] sm:$0xff]   ;;  %v555_v19 = vld [vmem:[#allocation2 + $0x30] sm:$0xff]   ;;  %v557_v21 = vld [vmem:[#allocation2 + $0x38] sm:$0xff]  }
  0x19   :  { %479 = vmatpush3.bf16.msra.mxu1 %v539_v3  ;;  %507 = vmatpush3.bf16.msra.mxu0 %v540_v4  ;;  %v556_v20 = vld [vmem:[#allocation2 + $0x70] sm:$0xff]   ;;  %v558_v22 = vld [vmem:[#allocation2 + $0x78] sm:$0xff]   ;;  %v34_v26 = vld [vmem:[%s708_s3] sm:$0x3] }
  0x1a   :  { %484 = vmatprep.subr.bf16.mxu1 %v602_v0  ;;  %512 = vmatprep.subr.bf16.mxu0 %v602_v0  ;;  %v433_v27 = vld [vmem:[%s708_s3 + $0x2] sm:$0x3]  ;;  %v42_v28 = vrot.slane %v34_v26, %v41_v25  ;;  %v127_v49 = vrot.slane %v34_v26, %v126_v48 }
  0x1b   :  { %v234_v29 = vrot.slane %v433_v27, %v41_v25  ;;  %v319_v50 = vrot.slane %v433_v27, %v126_v48 }
  0x1c   :  { %481 = vmatmul.mubr.msk.bf16.vlgmr.msra.gmra.mrb[0].mxu1 %vm60_vm1, %v541_v5  ;;  %509 = vmatmul.mubr.msk.bf16.vlgmr.msra.gmra.mrb[0].mxu0 %vm60_vm1, %v542_v6 }
  0x1d   :  { %485 = vmatpush3.bf16.msra.mxu1 %v543_v7  ;;  %513 = vmatpush3.bf16.msra.mxu0 %v544_v8 }
  0x1e   :  { %486 = vmatprep.subr.bf16.mxu1 %v602_v0  ;;  %514 = vmatprep.subr.bf16.mxu0 %v602_v0 }
  0x1f   :  { %500 = vmatprep.mubr.msk.bf16.mxu1 %vm603_vm0, %v602_v0  ;;  %528 = vmatprep.mubr.msk.bf16.mxu0 %vm603_vm0, %v602_v0 }
  0x21   :  { %487 = vmatpush3.bf16.msra.mxu1 %v545_v9  ;;  %515 = vmatpush3.bf16.msra.mxu0 %v546_v10 }
  0x22   :  { %488 = vmatprep.subr.bf16.mxu1 %v602_v0  ;;  %516 = vmatprep.subr.bf16.mxu0 %v602_v0 }
  0x25   :  { %489 = vmatpush3.bf16.msra.mxu1 %v547_v11  ;;  %517 = vmatpush3.bf16.msra.mxu0 %v548_v12 }
  0x26   :  { %490 = vmatprep.subr.bf16.mxu1 %v602_v0  ;;  %518 = vmatprep.subr.bf16.mxu0 %v602_v0 }
  0x29   :  { %491 = vmatpush3.bf16.msra.mxu1 %v549_v13  ;;  %519 = vmatpush3.bf16.msra.mxu0 %v550_v14 }
  0x2a   :  { %492 = vmatprep.subr.bf16.mxu1 %v602_v0  ;;  %520 = vmatprep.subr.bf16.mxu0 %v602_v0 }
  0x2d   :  { %493 = vmatpush3.bf16.msra.mxu1 %v551_v15  ;;  %521 = vmatpush3.bf16.msra.mxu0 %v552_v16 }
  0x2e   :  { %494 = vmatprep.subr.bf16.mxu1 %v602_v0  ;;  %522 = vmatprep.subr.bf16.mxu0 %v602_v0 }
  0x31   :  { %495 = vmatpush3.bf16.msra.mxu1 %v553_v17  ;;  %523 = vmatpush3.bf16.msra.mxu0 %v554_v18 }
  0x32   :  { %496 = vmatprep.subr.bf16.mxu1 %v602_v0  ;;  %524 = vmatprep.subr.bf16.mxu0 %v602_v0 }
  0x35   :  { %497 = vmatpush3.bf16.msra.mxu1 %v555_v19  ;;  %525 = vmatpush3.bf16.msra.mxu0 %v556_v20 }
  0x36   :  { %498 = vmatprep.subr.bf16.mxu1 %v602_v0  ;;  %526 = vmatprep.subr.bf16.mxu0 %v602_v0 }
  0x39   :  { %499 = vmatpush3.bf16.msra.mxu1 %v557_v21  ;;  %527 = vmatpush3.bf16.msra.mxu0 %v558_v22 }
  0xef   :  { %v98_v30 = vpop.f32.mrb[0].mxu1  ;;  %v289_v32 = vpop.f32.mrb[0].mxu0 }
  0xf0   :  { %v99_v31 = vadd.f32 %v98_v30, %v42_v28  ;;  %v482_v33 = vpop.f32.mrb[1].mxu1  ;;  %v290_v34 = vadd.f32 %v289_v32, %v234_v29  ;;  %v510_v35 = vpop.f32.mrb[1].mxu0 }
  0xf1   :  { %v101_v36 = vpop.f32.mrb[2].mxu1  ;;  %v292_v38 = vpop.f32.mrb[2].mxu0 }
  0xf2   :  { %559 = vtanh.f32 %v99_v31  ;;  %v102_v37 = vadd.f32 %v101_v36, %v42_v28  ;;  %v483_v39 = vpop.f32.mrb[3].mxu1  ;;  %v293_v40 = vadd.f32 %v292_v38, %v234_v29  ;;  %v511_v41 = vpop.f32.mrb[3].mxu0 }
  0xf3   :  { %561 = vtanh.f32 %v290_v34 }
  0xf4   :  { %563 = vtanh.f32 %v102_v37 }
  0xf5   :  { %565 = vtanh.f32 %v293_v40 }
  0xfc   :  { %v560_v42 = vpop.eup %559 }
  0xfd   :  { %v562_v43 = vpop.eup %561 }
  0xfe   :  { %v564_v44 = vpop.eup %563 }
  0xff   :  { %v566_v45 = vpop.eup %565  ;;  %v107_v46 = vpack.c.bf16 %v564_v44, %v560_v42 }
 0x100   :  { %v298_v47 = vpack.c.bf16 %v566_v45, %v562_v43 }
 0x101   :  { %501 = vmatmul.mubr.bf16.vlgmr.msra.gmra.mrb[4].mxu1 %v107_v46 }
 0x102   :  { %529 = vmatmul.mubr.bf16.vlgmr.msra.gmra.mrb[4].mxu0 %v298_v47 }
 0x1d4   :  { %v210_v51 = vpop.f32.mrb[4].mxu1 }
 0x1d5   :  { %v211_v52 = vadd.f32 %v210_v51, %v127_v49  ;;  %v402_v53 = vpop.f32.mrb[4].mxu0  ;;  %v502_v54 = vpop.f32.mrb[5].mxu1 }
 0x1d6   :  { %v403_v55 = vadd.f32 %v402_v53, %v319_v50  ;;  %v530_v56 = vpop.f32.mrb[5].mxu0  ;;  %v213_v57 = vpop.f32.mrb[6].mxu1 }
 0x1d7   :  { %567 = vtanh.f32 %v211_v52  ;;  %v214_v58 = vadd.f32 %v213_v57, %v127_v49  ;;  %v405_v59 = vpop.f32.mrb[6].mxu0  ;;  %v503_v60 = vpop.f32.mrb[7].mxu1 }
 0x1d8   :  { %569 = vtanh.f32 %v403_v55  ;;  %v406_v61 = vadd.f32 %v405_v59, %v319_v50  ;;  %v531_v62 = vpop.f32.mrb[7].mxu0 }
 0x1d9   :  { %571 = vtanh.f32 %v214_v58 }
 0x1da   :  { %573 = vtanh.f32 %v406_v61 }
 0x1e1   :  { %v568_v63 = vpop.eup %567 }
 0x1e2   :  { %v570_v0 = vpop.eup %569  ;;  %219 = vst [vmem:[%s709_s4] sm:$0xff] %v568_v63 }
 0x1e3   :  { %v572_v1 = vpop.eup %571  ;;  %450 = vst [vmem:[%s709_s4 + $0x10] sm:$0xff] %v570_v0 }
 0x1e4   :  { %v574_v2 = vpop.eup %573  ;;  %220 = vst [vmem:[%s709_s4 + $0x8] sm:$0xff] %v572_v1 }
 0x1e5   :  { %451 = vst [vmem:[%s709_s4 + $0x18] sm:$0xff] %v574_v2 }
 0x1e6   :  { %418 = vsyncpa [#allocation3], 1 }

</bundles_post_ra>
